<compile_context>
chip_gen: v7x
topology: tpu7x:2x2x1
jax: 0.10.0
libtpu: 0.0.40
codegen_flags: <defaults>
</compile_context>

<pallas_src>
import functools
import math

import jax
import jax.numpy as jnp
from jax.experimental import pallas as pl
from jax.experimental.pallas import tpu as pltpu

FPAD = 128                      # lane-dense feature width (all layer widths <= FPAD)
_VMEM_LIMIT = 32 * 1024 * 1024  # safe on v5e/v6e/v7x; our tiles use only a few MiB


def _round_up(x, m):
    return (x + m - 1) // m * m


def _vmem_spec():
    return pl.BlockSpec(memory_space=pltpu.MemorySpace.VMEM)


# ---------------------------------------------------------------------------
# Kernel 1: g = (f * f) @ W_pad   (row-tiled; W pre-padded to (FPAD, FPAD))
# Output stored bf16: it is the streamed operand of the next propagation matmul.
# ---------------------------------------------------------------------------
def _square_transform_kernel(f_ref, w_ref, out_ref):
    f = f_ref[...]
    out_ref[...] = jnp.dot(
        f * f, w_ref[...], preferred_element_type=jnp.float32
    ).astype(out_ref.dtype)


def square_transform(f, w_pad, *, tile_m):
    n = f.shape[0]
    return pl.pallas_call(
        _square_transform_kernel,
        out_shape=jax.ShapeDtypeStruct((n, FPAD), jnp.bfloat16),
        grid_spec=pltpu.PrefetchScalarGridSpec(
            num_scalar_prefetch=0,
            grid=(n // tile_m,),
            in_specs=[
                pl.BlockSpec((tile_m, FPAD), lambda m: (m, 0)),
                pl.BlockSpec((FPAD, FPAD), lambda m: (0, 0)),
            ],
            out_specs=pl.BlockSpec((tile_m, FPAD), lambda m: (m, 0)),
        ),
        compiler_params=pltpu.CompilerParams(
            dimension_semantics=("parallel",),
            vmem_limit_bytes=_VMEM_LIMIT,
        ),
    )(f, w_pad)


# ---------------------------------------------------------------------------
# Kernel 2: tiled propagation P = L @ G  (+ optional bias & ReLU epilogue)
# ---------------------------------------------------------------------------
def _prop_kernel(l_ref, g_ref, b_ref, out_ref, acc_ref, *, apply_epilogue):
    k = pl.program_id(1)

    @pl.when(k == 0)
    def _():
        acc_ref[...] = jnp.zeros_like(acc_ref)

    acc_ref[...] += jnp.dot(
        l_ref[...], g_ref[...], preferred_element_type=jnp.float32
    )

    @pl.when(k == pl.num_programs(1) - 1)
    def _():
        r = acc_ref[...]
        if apply_epilogue:
            r = jnp.maximum(r + b_ref[...], 0.0)
        out_ref[...] = r.astype(out_ref.dtype)


def propagate(l_bf16, g_bf16, bias, *, tile_m, tile_k, apply_epilogue, out_dtype):
    n = l_bf16.shape[0]
    kernel = functools.partial(_prop_kernel, apply_epilogue=apply_epilogue)
    return pl.pallas_call(
        kernel,
        out_shape=jax.ShapeDtypeStruct((n, FPAD), out_dtype),
        grid_spec=pltpu.PrefetchScalarGridSpec(
            num_scalar_prefetch=0,
            grid=(n // tile_m, n // tile_k),
            in_specs=[
                pl.BlockSpec((tile_m, tile_k), lambda m, k: (m, k)),
                pl.BlockSpec((tile_k, FPAD), lambda m, k: (k, 0)),
                pl.BlockSpec((1, FPAD), lambda m, k: (0, 0)),
            ],
            out_specs=pl.BlockSpec((tile_m, FPAD), lambda m, k: (m, 0)),
            scratch_shapes=[pltpu.VMEM((tile_m, FPAD), jnp.float32)],
        ),
        compiler_params=pltpu.CompilerParams(
            dimension_semantics=("parallel", "arbitrary"),
            vmem_limit_bytes=_VMEM_LIMIT,
        ),
    )(l_bf16, g_bf16, bias)


# ---------------------------------------------------------------------------
# Kernel 3: fused MLP head (2 linears + ReLU, score as a VPU row reduction)
# ---------------------------------------------------------------------------
def _mlp_head_kernel(x_ref, w1_ref, b1_ref, w2_ref, b2_ref, wo_ref, bo_ref, out_ref):
    h = jnp.dot(x_ref[...], w1_ref[...], preferred_element_type=jnp.float32) + b1_ref[...]
    h = jnp.maximum(h, 0.0)
    h = jnp.dot(h, w2_ref[...], preferred_element_type=jnp.float32) + b2_ref[...]
    h = jnp.maximum(h, 0.0)
    # Final (embedSize -> 1) projection as a reduction, not a 1-wide MXU matmul.
    out_ref[...] = jnp.sum(h * wo_ref[...], axis=1, keepdims=True) + bo_ref[...]


def mlp_head(x, w1, b1, w2, b2, wo_row, bo):
    b = x.shape[0]
    return pl.pallas_call(
        _mlp_head_kernel,
        out_shape=jax.ShapeDtypeStruct((b, 1), jnp.float32),
        in_specs=[_vmem_spec()] * 7,
        out_specs=_vmem_spec(),
    )(x, w1, b1, w2, b2, wo_row, bo)


# ---------------------------------------------------------------------------
# Parameter init (deterministic, mirrors the PyTorch __init__s; weights stored
# transposed (in_f, out_f) and GNN weights zero-padded to (FPAD, FPAD))
# ---------------------------------------------------------------------------
def xavier_uniform_t(key, in_f, out_f):
    a = (6.0 / (in_f + out_f)) ** 0.5
    return jax.random.uniform(key, (in_f, out_f), jnp.float32, -a, a)


def init_params(key, userNum, itemNum, embedSize, layers):
    assert layers[0] == embedSize
    assert embedSize <= FPAD and all(l <= FPAD for l in layers)
    n_gnn = len(layers) - 1
    keys = jax.random.split(key, 5 + n_gnn)
    params = {}
    params["uEmbd"] = 0.01 * jax.random.normal(keys[0], (userNum, embedSize), jnp.float32)
    params["iEmbd"] = 0.01 * jax.random.normal(keys[1], (itemNum, embedSize), jnp.float32)
    gnn = []
    for li, (From, To) in enumerate(zip(layers[:-1], layers[1:])):
        w = xavier_uniform_t(keys[2 + li], From, To)
        w_pad = jnp.zeros((FPAD, FPAD), jnp.float32).at[:From, :To].set(w)
        b_pad = jnp.zeros((1, FPAD), jnp.float32)   # torch bias zero-init
        gnn.append((w_pad, b_pad, To))
    params["gnn"] = gnn
    S = sum(layers)
    k = 2 + n_gnn
    params["W1"] = xavier_uniform_t(keys[k + 0], 2 * S, S)
    params["b1"] = jnp.zeros((1, S), jnp.float32)
    params["W2"] = xavier_uniform_t(keys[k + 1], S, embedSize)
    params["b2"] = jnp.zeros((1, embedSize), jnp.float32)
    params["wo"] = xavier_uniform_t(keys[k + 2], embedSize, 1).T   # (1, E)
    params["bo"] = jnp.zeros((1, 1), jnp.float32)
    return params


# ---------------------------------------------------------------------------
# Full forward (glue in plain JAX, hot paths in the Pallas kernels above)
# ---------------------------------------------------------------------------
def ngcfmlp_forward(params, L, userIdx, itemIdx, userNum, *, tile_m=512, tile_k=512):
    assert tile_m % 8 == 0 and tile_k % 128 == 0
    N = L.shape[0]
    E = params["uEmbd"].shape[1]
    Np = _round_up(N, math.lcm(tile_m, tile_k))

    # Pad the Laplacian to the tile grid and cast to bf16 ONCE (it is streamed
    # twice per GNN layer — bf16 halves the mem-bound HBM traffic).
    L_bf = jnp.zeros((Np, Np), jnp.bfloat16).at[:N, :N].set(L.astype(jnp.bfloat16))

    # Initial features, zero-padded to a lane-dense (Np, 128) slab.
    feats0 = jnp.concatenate([params["uEmbd"], params["iEmbd"]], axis=0)   # (N, E)
    f = jnp.zeros((Np, FPAD), jnp.float32).at[:N, :E].set(feats0)

    # Track each layer's (padded) output + its true width; rows are only
    # gathered / concatenated for the B requested users/items at the end.
    per_layer = [(f, E)]
    for (w_pad, b_pad, To) in params["gnn"]:
        # out = relu(L @ (L @ ((f*f) @ W^T)) + b)   (associativity reorder)
        g = square_transform(f, w_pad, tile_m=tile_m)                        # (Np,128) bf16
        inter = propagate(L_bf, g, b_pad, tile_m=tile_m, tile_k=tile_k,
                          apply_epilogue=False, out_dtype=jnp.bfloat16)      # (Np,128) bf16
        f = propagate(L_bf, inter, b_pad, tile_m=tile_m, tile_k=tile_k,
                      apply_epilogue=True, out_dtype=jnp.float32)            # (Np,128) f32
        per_layer.append((f, To))

    # finalEmbd row gather (only B rows ever materialized, no per-layer concat of
    # the full (N, sum(layers)) matrix).
    # TODO(synk): could be fused into the head kernel with PrefetchScalarGridSpec
    # + pl.Element row gathers; left in plain JAX since the head is second-order.
    itemRows = itemIdx + userNum
    userE = jnp.concatenate([arr[userIdx][:, :w] for arr, w in per_layer], axis=1)
    itemE = jnp.concatenate([arr[itemRows][:, :w] for arr, w in per_layer], axis=1)
    embd = jnp.concatenate([userE, itemE], axis=1)                           # (B, 2*sum(layers))

    out = mlp_head(embd, params["W1"], params["b1"], params["W2"], params["b2"],
                   params["wo"], params["bo"])                               # (B, 1)
    return out.reshape(-1)


def build_laplacian(key, userNum, itemNum):
    # Deterministic dense symmetric-normalized bipartite adjacency (the PyTorch
    # model receives this pre-built & sparse; we densify it here).
    N = userNum + itemNum
    R = (jax.random.uniform(key, (userNum, itemNum)) < 0.3).astype(jnp.float32)
    A = jnp.zeros((N, N), jnp.float32)
    A = A.at[:userNum, userNum:].set(R)
    A = A.at[userNum:, :userNum].set(R.T)
    deg = jnp.maximum(A.sum(axis=1), 1.0)
    d_inv_sqrt = 1.0 / jnp.sqrt(deg)
    return A * d_inv_sqrt[:, None] * d_inv_sqrt[None, :]


if __name__ == "__main__":
    userNum, itemNum = 150, 106      # N = 256 -> 2x2 propagation grid at tile 128
    embedSize = 16
    layers = [16, 16, 8]             # layers[0] == embedSize, as the module requires
    B = 8

    key = jax.random.PRNGKey(0)
    k_param, k_adj, k_u, k_i = jax.random.split(key, 4)

    params = init_params(k_param, userNum, itemNum, embedSize, layers)
    L = build_laplacian(k_adj, userNum, itemNum)
    userIdx = jax.random.randint(k_u, (B,), 0, userNum)
    itemIdx = jax.random.randint(k_i, (B,), 0, itemNum)

    out = ngcfmlp_forward(params, L, userIdx, itemIdx, userNum,
                          tile_m=128, tile_k=128)
    out = jax.block_until_ready(out)
    assert out.shape == (B,) and out.dtype == jnp.float32
    print("KERNEL_OK")
</pallas_src>

<mosaic_0001>
module attributes {stable_mosaic.version = 11 : i64} {
  func.func @_square_transform_kernel(%arg0: i32, %arg1: memref<128x128xf32, #tpu.memory_space<vmem>>, %arg2: memref<128x128xf32, #tpu.memory_space<vmem>>, %arg3: memref<128x128xbf16, #tpu.memory_space<vmem>>) attributes {dimension_semantics = [#tpu.dimension_semantics<parallel>], iteration_bounds = array<i64: 2>, scalar_prefetch = 0 : i64, scratch_operands = 0 : i64, tpu.core_type = #tpu.core_type<tc>, window_params = [{transform_indices = @transform_0, window_bounds = array<i64: 128, 128>}, {pipeline_mode = #tpu.pipeline_mode<synchronous>, transform_indices = @transform_1, window_bounds = array<i64: 128, 128>}, {transform_indices = @transform_2, window_bounds = array<i64: 128, 128>}]} {
    %c0 = arith.constant 0 : index
    %c0_0 = arith.constant 0 : index
    %0 = vector.load %arg1[%c0, %c0_0] : memref<128x128xf32, #tpu.memory_space<vmem>>, vector<128x128xf32>
    %1 = arith.mulf %0, %0 : vector<128x128xf32>
    %c0_1 = arith.constant 0 : index
    %c0_2 = arith.constant 0 : index
    %2 = vector.load %arg2[%c0_1, %c0_2] : memref<128x128xf32, #tpu.memory_space<vmem>>, vector<128x128xf32>
    %cst = arith.constant dense<0.000000e+00> : vector<128x128xf32>
    %3 = tpu.matmul %1, %2, %cst {dimension_numbers = #tpu.dot_dimension_numbers<[1], [0], [0], [1], [0, 0, 1, 1], [], []>} : vector<128x128xf32>, vector<128x128xf32>, vector<128x128xf32> -> vector<128x128xf32>
    %4 = arith.truncf %3 : vector<128x128xf32> to vector<128x128xbf16>
    %c0_3 = arith.constant 0 : index
    %c0_4 = arith.constant 0 : index
    %5 = vector.load %arg3[%c0_3, %c0_4] : memref<128x128xbf16, #tpu.memory_space<vmem>>, vector<128x128xbf16>
    tpu.vector_store %arg3[%c0_3, %c0_4], %4 {strides = array<i32>} : memref<128x128xbf16, #tpu.memory_space<vmem>>, vector<128x128xbf16>,
    return
  }
  func.func @transform_0(%arg0: i32) -> (i32, i32) {
    %c0_i32 = arith.constant 0 : i32
    %c0_i32_0 = arith.constant 0 : i32
    return %arg0, %c0_i32 : i32, i32
  }
  func.func @transform_1(%arg0: i32) -> (i32, i32) {
    %c0_i32 = arith.constant 0 : i32
    %c0_i32_0 = arith.constant 0 : i32
    %c0_i32_1 = arith.constant 0 : i32
    return %c0_i32, %c0_i32_0 : i32, i32
  }
  func.func @transform_2(%arg0: i32) -> (i32, i32) {
    %c0_i32 = arith.constant 0 : i32
    %c0_i32_0 = arith.constant 0 : i32
    return %arg0, %c0_i32 : i32, i32
  }
}

</mosaic_0001>

<bundles_post_ra>
// kernel: tpu_custom_call.1
= control target key start
LH: loop header
LB: loop body
LE: loop exit
PB: predicated region body
PF: predicated region fallthrough
CT: control target
= control target key end

     0   :  { %7 = vsyncpa [#allocation3], 0  ;;  %s1221_s0 = inlined_call_operand.hbm [shape: f32[256,128], index: 0, kind: input, shape index: {}]   ;;  %s1222_s1 = inlined_call_operand.hbm [shape: f32[128,128], index: 1, kind: input, shape index: {}]   ;;  %s1223_s2 = inlined_call_operand.hbm [shape: bf16[256,128], index: 2, kind: output, shape index: {}]  }
   0x1   :  { %9 = vsyncpa [#allocation3 + $0x1], 0 }
   0x2   :  { %10 = vsyncpa [#allocation6], 0 }
   0x3   :  { %11 = vsyncpa [#allocation4], 0 }
   0x4   :  { %13 = vsyncpa [#allocation4 + $0x1], 0  ;;  %s995_s9 = smov 0   ;;  %s997_s10 = smov 0  }
   0x5   :  { %s999_s11 = smov 0   ;;  %s1001_s12 = smov 0  }
   0x6 LB: > { %s1016_s13 = sadd.s32 4294967295, %s971_s12   ;;  %s549_s14 = sadd.s32 4294967294, %s971_s12   ;;  %s971_s12 = sphi %s1001_s12, %s1243_s12   ;;  %s967_s11 = sphi %s999_s11, %s1242_s11   ;;  %s963_s10 = sphi %s997_s10, %s1241_s10   ;;  %s959_s9 = sphi %s995_s9, %s1240_s9  }
   0x7   : > { %p39_p0 = scmp.ne.s32.totalorder %s963_s10, %s959_s9  ;;  %p1224_p1 = scmp.eq.s32.totalorder %s1016_s13, 0 }
   0x8   : > { %p90_p3 = scmp.eq.s32.totalorder %s549_s14, 1  ;;  %p550_p5 = scmp.ge.s32.totalorder %s971_s12, 1 }
   0x9   : > { %p1025_p4 = por %p1224_p1, %p39_p0  ;;  %p97_p7 = scmp.lt.s32.totalorder %s971_s12, 3 }
   0xa   : > { %p1030_p6 = por %p90_p3, %p39_p0  ;;  %s973_s18 = smov [#allocation5]  }
   0xb   : > { %s1227_s15 = scalar_select %p1025_p4, 1, 0 }
   0xc   : > { %s1228_s16 = scalar_select %p1030_p6, 1, 0 }
   0xd   : > { %p1035_p8 = pnand %p550_p5, %p97_p7  ;;  %s109_s19 = sshll.u32 %s973_s18, 4  ;;  %s1039_s19 = int_to_ptr.vmem [resolvable:$true] %s109_s19 }
   0xe   : > { %s1051_s21 = sadd.s32 1, %s971_s12   ;;  %s26_s22 = sadd.s32 1, %s967_s11 }
   0xf   : > { %s1229_s17 = scalar_select %p1035_p8, 1, 0 }
  0x10   : > { %p790_p9 = pneg %p1035_p8  ;;  %s23_s23 = ssub.s32 %s971_s12, %s1051_s21 }
  0x11   : > { %s843_s26 = scalar_lea.hbm %s1222_s1, 2048 }
  0x12   : > { %p1046_p11 = pnand %p790_p9, %p1224_p1  ;;  %p844_p12 = scmp.ne.s32.totalorder %s1222_s1, %s843_s26 }
  0x13   : > { %p850_p5 = scmp.lt.u32.totalorder %s843_s26, %s1222_s1 }
  0x14   : > { %p845_p13 = pneg %p1046_p11 }
  0x16   : > { %p846_p0 = pnand %p845_p13, %p844_p12 }
  0x18   : > { %p847_p3 = pneg %p846_p0 }
  0x1a   : > { %p852_p7 = pnand %p850_p5, %p847_p3 }
  0x1c   : > { %855 = shalt.err (!%p852_p7)
}
  0x1d   : > { %s856_s3 = scalar_lea.vmem %s1039_s19, 2048  ;;  %p864_p2 = scmp.lt.s32.totalorder %s1039_s19, %s1039_s19 }
  0x1e   : > { %p857_p9 = scmp.ne.s32.totalorder %s1039_s19, %s856_s3  ;;  %p865_p6 = scmp.lt.s32.totalorder %s856_s3, %s856_s3 }
  0x20   : > { %p859_p10 = pnand %p857_p9, %p845_p13  ;;  %p866_p4 = por %p865_p6, %p864_p2 }
  0x22   : > { %p860_p1 = pneg %p859_p10 }
  0x24   : > { %p867_p8 = pnand %p866_p4, %p860_p1 }
  0x26   : > { %870 = shalt.err (!%p867_p8)
}
  0x27   : > { %s974_s4 = smov 128   ;;  %s975_s5 = smov 8  }
  0x28   : > { %793 = dma.hbm_to_vmem [thread:$0]  (!%p1046_p11), %s1222_s1, 2048, %s1039_s19, [#allocation6], %s974_s4, %s974_s4, %s975_s5  }
  0x29   : > { %p24_p1 = scmp.eq.s32.totalorder %s23_s23, 0  ;;  %p33_p2 = scmp.ne.s32.totalorder %s967_s11, %s963_s10 }
  0x2a   : > { %p34_p4 = scmp.eq.s32.totalorder %s971_s12, 0  ;;  %p803_p6 = scmp.lt.s32.totalorder %s971_s12, 2 }
  0x2b   : > { %s1085_s8 = scalar_select %p24_p1, %s967_s11, %s26_s22  }
  0x2c   : > { %p35_p8 = por %p34_p4, %p33_p2  ;;  %p1231_p10 = scmp.eq.s32.totalorder %s1016_s13, 1 }
  0x2d   : > { %s123_s18 = sand.u32 1, %s967_s11   ;;  %s581_s20 = sshll.u32 %s971_s12, 11 }
  0x2e   : > { %p1089_p12 = por %p1231_p10, %p33_p2  ;;  %s553_s24 = sshll.u32 %s123_s18, 7 }
  0x2f   : > { %s1098_s27 = scalar_lea.hbm %s1221_s0, %s581_s20  ;;  %s127_s19 = scalar_lea.vmem [#allocation2], %s553_s24 }
  0x30   : > { %s134_s22 = sshll.u32 %s127_s19, 4  ;;  %p1100_p11 = pnand %p803_p6, %p35_p8  ;;  %s1104_s22 = int_to_ptr.vmem [resolvable:$true] %s134_s22 }
  0x31   : > { %s1106_s28 = scalar_lea.sflag [#allocation3], %s123_s18  ;;  %s871_s29 = scalar_lea.hbm %s1098_s27, 2048 }
  0x32   : > { %p872_p13 = scmp.ne.s32.totalorder %s1098_s27, %s871_s29  ;;  %p873_p0 = pneg %p1100_p11 }
  0x33   : > { %s876_s6 = scalar_lea.hbm %s1221_s0, 4096  ;;  %p877_p7 = scmp.lt.u32.totalorder %s1098_s27, %s1221_s0 }
  0x34   : > { %p874_p3 = pnand %p873_p0, %p872_p13  ;;  %p878_p9 = scmp.lt.u32.totalorder %s876_s6, %s871_s29 }
  0x35   : > { %p880_p2 = scmp.lt.u32.totalorder %s871_s29, %s1098_s27 }
  0x36   : > { %p875_p5 = pneg %p874_p3  ;;  %p879_p1 = por %p878_p9, %p877_p7 }
  0x38   : > { %p881_p4 = por %p880_p2, %p879_p1 }
  0x3a   : > { %p882_p6 = pnand %p881_p4, %p875_p5 }
  0x3c   : > { %885 = shalt.err (!%p882_p6)
}
  0x3d   : > { %s886_s18 = scalar_lea.vmem %s1104_s22, 2048  ;;  %s976_s24 = smov [#allocation2]  }
  0x3e   : > { %p887_p8 = scmp.ne.s32.totalorder %s1104_s22, %s886_s18  ;;  %s891_s25 = sshll.u32 %s976_s24, 4  ;;  %s892_s25 = int_to_ptr.vmem [resolvable:$false] %s891_s25 }
  0x3f   : > { %s893_s26 = scalar_lea.vmem %s892_s25, 4096  ;;  %p894_p3 = scmp.lt.s32.totalorder %s1104_s22, %s892_s25 }
  0x40   : > { %p889_p10 = pnand %p887_p8, %p873_p0  ;;  %p895_p7 = scmp.lt.s32.totalorder %s893_s26, %s886_s18 }
  0x42   : > { %p890_p13 = pneg %p889_p10  ;;  %p896_p9 = por %p895_p7, %p894_p3 }
  0x44   : > { %p897_p1 = pnand %p896_p9, %p890_p13 }
  0x46   : > { %900 = shalt.err (!%p897_p1)
}
  0x47   : > { %797 = dma.hbm_to_vmem [thread:$0]  (!%p1100_p11), %s1098_s27, 2048, %s1104_s22, %s1106_s28, %s974_s4, %s974_s4, %s975_s5  }
  0x48   : > { %p1234_p0 = scmp.ne.s32.totalorder %s1229_s17, 0 }
  0x49   : > { %s1140_s19 = sand.u32 (!%p1234_p0), 1, %s963_s10   ;;  %p1235_p5 = scmp.ne.s32.totalorder (!%p1234_p0), %s1227_s15, 0 }
  0x4a   : > { %146 = sbr.rel (%p1234_p0) target bundleno = 362 (0x16a), region = 28  ;;  %s557_s29 = sshll.u32 (!%p1234_p0), %s1140_s19, 7 }
  0x4b   : > { %s149_s30 = scalar_lea.sflag (!%p1234_p0), [#allocation3], %s1140_s19  ;;  %s1144_s3 = scalar_lea.vmem (!%p1234_p0), [#allocation2], %s557_s29 }
  0x51   : > { %946 = dma.done.wait (%p1235_p5), %s149_s30, 2048  }
  0x52   : > { %948 = vsyncadd (%p1235_p5), %s149_s30, 4294965248  ;;  %p1236_p11 = scmp.eq.s32.totalorder %s1016_s13, 0 }
  0x54   : > { %950 = dma.done.wait (%p1236_p11), [#allocation6], 2048   ;;  %p1237_p2 = pmov %p1236_p11 }
  0x55   : > { %v211_v0 = vld [vmem:[#allocation5] sm:$0xff]  ;;  %v212_v1 = vld [vmem:[#allocation5 + $0x8] sm:$0xff]  ;;  %v213_v2 = vld [vmem:[#allocation5 + $0x10] sm:$0xff]  ;;  %s559_s15 = sshll.u32 %s1140_s19, 6  ;;  %s598_s5 = sshll.u32 %s1016_s13, 10 }
  0x56   : > { %952 = vsyncadd (%p1237_p2), [#allocation6], 4294965248  ;;  %v734_v3 = vpack.c.bf16 %v212_v1, %v211_v0  ;;  %v214_v4 = vld [vmem:[#allocation5 + $0x18] sm:$0xff]  ;;  %v215_v6 = vld [vmem:[#allocation5 + $0x20] sm:$0xff]  ;;  %s176_s17 = scalar_lea.vmem [#allocation7], %s559_s15  ;;  %s1177_s23 = scalar_lea.hbm %s1223_s2, %s598_s5 }
  0x57   : > { %v738_v5 = vpack.c.bf16 %v214_v4, %v213_v2  ;;  %v216_v7 = vld [vmem:[#allocation5 + $0x28] sm:$0xff]  ;;  %v179_v9 = vld [vmem:[%s1144_s3] sm:$0xff]  ;;  %v217_v11 = vld [vmem:[#allocation5 + $0x30] sm:$0xff]  ;;  %s466_s4 = sshll.u32 %s176_s17, 4  ;;  %s453_s13 = scalar_lea.sflag [#allocation4], %s1140_s19  ;;  %s1172_s4 = int_to_ptr.vmem [resolvable:$true] %s466_s4 }
  0x58   : > { %735 = vmatprep.subr.bf16.mxu0 %v734_v3  ;;  %766 = vmatprep.subr.bf16.mxu1 %v734_v3  ;;  %v742_v8 = vpack.c.bf16 %v216_v7, %v215_v6  ;;  %v187_v10 = vld [vmem:[%s1144_s3 + $0x40] sm:$0xff]  ;;  %v218_v12 = vld [vmem:[#allocation5 + $0x38] sm:$0xff]  ;;  %v195_v13 = vmul.f32 %v179_v9, %v179_v9  ;;  %v220_v17 = vld [vmem:[#allocation5 + $0x48] sm:$0xff]  ;;  %s901_s28 = scalar_lea.vmem %s1172_s4, 1024  ;;  %s977_s6 = smov [#allocation7]  }
  0x59   : > { %737 = vmatpush3.bf16.msra.mxu0 %v734_v3  ;;  %774 = vmatpush3.bf16.msra.mxu1 %v734_v3  ;;  %v203_v14 = vmul.f32 %v187_v10, %v187_v10  ;;  %v746_v15 = vpack.c.bf16 %v218_v12, %v217_v11  ;;  %v219_v16 = vld [vmem:[#allocation5 + $0x40] sm:$0xff]  ;;  %v221_v19 = vld [vmem:[#allocation5 + $0x50] sm:$0xff]  ;;  %v222_v20 = vld [vmem:[#allocation5 + $0x58] sm:$0xff]  ;;  %p902_p4 = scmp.ne.s32.totalorder %s1172_s4, %s901_s28  ;;  %s905_s7 = sshll.u32 %s977_s6, 4  ;;  %s906_s7 = int_to_ptr.vmem [resolvable:$false] %s905_s7 }
  0x5a   : > { %739 = vmatprep.subr.bf16.mxu0 %v738_v5  ;;  %767 = vmatprep.subr.bf16.mxu1 %v738_v5  ;;  %v750_v18 = vpack.c.bf16 %v220_v17, %v219_v16  ;;  %v754_v21 = vpack.c.bf16 %v222_v20, %v221_v19  ;;  %v223_v22 = vld [vmem:[#allocation5 + $0x60] sm:$0xff]  ;;  %v224_v23 = vld [vmem:[#allocation5 + $0x68] sm:$0xff]  ;;  %v225_v25 = vld [vmem:[#allocation5 + $0x70] sm:$0xff]  ;;  %s907_s20 = scalar_lea.vmem %s906_s7, 2048  ;;  %p908_p10 = scmp.lt.s32.totalorder %s1172_s4, %s906_s7 }
  0x5b   : > { %710 = vmatprep.mubr.f32.mxu0 %v195_v13  ;;  %722 = vmatprep.mubr.f32.mxu1 %v203_v14  ;;  %v758_v24 = vpack.c.bf16 %v224_v23, %v223_v22  ;;  %v226_v26 = vld [vmem:[#allocation5 + $0x78] sm:$0xff]  ;;  %v180_v28 = vld [vmem:[%s1144_s3 + $0x8] sm:$0xff]  ;;  %v181_v30 = vld [vmem:[%s1144_s3 + $0x10] sm:$0xff]  ;;  %p903_p6 = pnand %p902_p4, %p1089_p12  ;;  %p909_p13 = scmp.lt.s32.totalorder %s907_s20, %s901_s28 }
  0x5c   : > { %v762_v27 = vpack.c.bf16 %v226_v26, %v225_v25  ;;  %v188_v29 = vld [vmem:[%s1144_s3 + $0x48] sm:$0xff]  ;;  %v189_v31 = vld [vmem:[%s1144_s3 + $0x50] sm:$0xff]  ;;  %v196_v32 = vmul.f32 %v180_v28, %v180_v28  ;;  %v197_v34 = vmul.f32 %v181_v30, %v181_v30  ;;  %v182_v36 = vld [vmem:[%s1144_s3 + $0x18] sm:$0xff] }
  0x5d   : > { %741 = vmatpush3.bf16.msra.mxu0 %v738_v5  ;;  %775 = vmatpush3.bf16.msra.mxu1 %v738_v5  ;;  %v204_v33 = vmul.f32 %v188_v29, %v188_v29  ;;  %v205_v35 = vmul.f32 %v189_v31, %v189_v31  ;;  %v190_v37 = vld [vmem:[%s1144_s3 + $0x58] sm:$0xff]  ;;  %v183_v38 = vld [vmem:[%s1144_s3 + $0x20] sm:$0xff]  ;;  %v198_v40 = vmul.f32 %v182_v36, %v182_v36  ;;  %v184_v44 = vld [vmem:[%s1144_s3 + $0x28] sm:$0xff]  ;;  %p904_p8 = pneg %p903_p6  ;;  %p910_p3 = por %p909_p13, %p908_p10 }
  0x5e   : > { %743 = vmatprep.subr.bf16.mxu0 %v742_v8  ;;  %768 = vmatprep.subr.bf16.mxu1 %v742_v8  ;;  %v191_v39 = vld [vmem:[%s1144_s3 + $0x60] sm:$0xff]  ;;  %v206_v41 = vmul.f32 %v190_v37, %v190_v37  ;;  %v199_v42 = vmul.f32 %v183_v38, %v183_v38  ;;  %v192_v45 = vld [vmem:[%s1144_s3 + $0x68] sm:$0xff]  ;;  %v185_v46 = vld [vmem:[%s1144_s3 + $0x30] sm:$0xff]  ;;  %v200_v48 = vmul.f32 %v184_v44, %v184_v44 }
  0x5f   : > { %v207_v43 = vmul.f32 %v191_v39, %v191_v39  ;;  %v193_v47 = vld [vmem:[%s1144_s3 + $0x70] sm:$0xff]  ;;  %v208_v49 = vmul.f32 %v192_v45, %v192_v45  ;;  %v201_v50 = vmul.f32 %v185_v46, %v185_v46  ;;  %v186_v52 = vld [vmem:[%s1144_s3 + $0x38] sm:$0xff]  ;;  %p911_p7 = pnand %p910_p3, %p904_p8 }
  0x60   : > { %v209_v51 = vmul.f32 %v193_v47, %v193_v47  ;;  %v194_v53 = vld [vmem:[%s1144_s3 + $0x78] sm:$0xff]  ;;  %v202_v54 = vmul.f32 %v186_v52, %v186_v52 }
  0x61   : > { %745 = vmatpush3.bf16.msra.mxu0 %v742_v8  ;;  %776 = vmatpush3.bf16.msra.mxu1 %v742_v8  ;;  %v210_v55 = vmul.f32 %v194_v53, %v194_v53 }
  0x62   : > { %747 = vmatprep.subr.bf16.mxu0 %v746_v15  ;;  %769 = vmatprep.subr.bf16.mxu1 %v746_v15 }
  0x65   : > { %749 = vmatpush3.bf16.msra.mxu0 %v746_v15  ;;  %777 = vmatpush3.bf16.msra.mxu1 %v746_v15 }
  0x66   : > { %751 = vmatprep.subr.bf16.mxu0 %v750_v18  ;;  %770 = vmatprep.subr.bf16.mxu1 %v750_v18 }
  0x69   : > { %753 = vmatpush3.bf16.msra.mxu0 %v750_v18  ;;  %778 = vmatpush3.bf16.msra.mxu1 %v750_v18 }
  0x6a   : > { %755 = vmatprep.subr.bf16.mxu0 %v754_v21  ;;  %771 = vmatprep.subr.bf16.mxu1 %v754_v21 }
  0x6d   : > { %757 = vmatpush3.bf16.msra.mxu0 %v754_v21  ;;  %779 = vmatpush3.bf16.msra.mxu1 %v754_v21 }
  0x6e   : > { %759 = vmatprep.subr.bf16.mxu0 %v758_v24  ;;  %772 = vmatprep.subr.bf16.mxu1 %v758_v24 }
  0x71   : > { %761 = vmatpush3.bf16.msra.mxu0 %v758_v24  ;;  %780 = vmatpush3.bf16.msra.mxu1 %v758_v24 }
  0x72   : > { %763 = vmatprep.subr.bf16.mxu0 %v762_v27  ;;  %773 = vmatprep.subr.bf16.mxu1 %v762_v27 }
  0x75   : > { %765 = vmatpush3.bf16.msra.mxu0 %v762_v27  ;;  %781 = vmatpush3.bf16.msra.mxu1 %v762_v27 }
  0x78   : > { %711 = vmatmul.mubr.f32.vlgmr.msra.gmra.mrb[0].mxu0 %v196_v32  ;;  %723 = vmatmul.mubr.f32.vlgmr.msra.gmra.mrb[0].mxu1 %v204_v33 }
  0x79   : > { %713 = vmatprep.mubr.f32.mxu0 %v197_v34  ;;  %725 = vmatprep.mubr.f32.mxu1 %v205_v35 }
  0x7c   : > { %714 = vmatmul.mubr.f32.gmra.mrb[2].mxu0 %v198_v40  ;;  %726 = vmatmul.mubr.f32.gmra.mrb[2].mxu1 %v206_v41 }
  0x7d   : > { %716 = vmatprep.mubr.f32.mxu0 %v199_v42  ;;  %728 = vmatprep.mubr.f32.mxu1 %v207_v43 }
  0x80   : > { %717 = vmatmul.mubr.f32.gmra.mrb[4].mxu0 %v200_v48  ;;  %729 = vmatmul.mubr.f32.gmra.mrb[4].mxu1 %v208_v49 }
  0x81   : > { %719 = vmatprep.mubr.f32.mxu0 %v201_v50  ;;  %731 = vmatprep.mubr.f32.mxu1 %v209_v51 }
  0x84   : > { %720 = vmatmul.mubr.f32.gmra.mrb[6].mxu0 %v202_v54  ;;  %732 = vmatmul.mubr.f32.gmra.mrb[6].mxu1 %v210_v55 }
 0x14b   : > { %v712_v56 = vpop.f32.mrb[0].mxu0  ;;  %v724_v57 = vpop.f32.mrb[0].mxu1 }
 0x14c   : > { %v293_v58 = vpop.f32.mrb[1].mxu0  ;;  %v333_v59 = vpop.f32.mrb[1].mxu1 }
 0x14d   : > { %v602_v60 = vpack.c.bf16 %v712_v56, %v293_v58  ;;  %v622_v61 = vpack.c.bf16 %v724_v57, %v333_v59 }
 0x14f   : > { %603 = vst [vmem:[%s176_s17] sm:$0xff] %v602_v60   ;;  %642 = vst [vmem:[%s176_s17 + $0x20] sm:$0xff] %v622_v61   ;;  %v715_v62 = vpop.f32.mrb[2].mxu0  ;;  %v727_v63 = vpop.f32.mrb[2].mxu1 }
 0x150   : > { %v303_v0 = vpop.f32.mrb[3].mxu0  ;;  %v343_v1 = vpop.f32.mrb[3].mxu1 }
 0x151   : > { %v607_v2 = vpack.c.bf16 %v715_v62, %v303_v0  ;;  %v627_v3 = vpack.c.bf16 %v727_v63, %v343_v1 }
 0x153   : > { %639 = vst [vmem:[%s176_s17 + $0x8] sm:$0xff] %v607_v2   ;;  %643 = vst [vmem:[%s176_s17 + $0x28] sm:$0xff] %v627_v3   ;;  %v718_v4 = vpop.f32.mrb[4].mxu0  ;;  %v730_v5 = vpop.f32.mrb[4].mxu1 }
 0x154   : > { %v313_v6 = vpop.f32.mrb[5].mxu0  ;;  %v353_v7 = vpop.f32.mrb[5].mxu1 }
 0x155   : > { %v612_v8 = vpack.c.bf16 %v718_v4, %v313_v6  ;;  %v632_v9 = vpack.c.bf16 %v730_v5, %v353_v7 }
 0x157   : > { %640 = vst [vmem:[%s176_s17 + $0x10] sm:$0xff] %v612_v8   ;;  %644 = vst [vmem:[%s176_s17 + $0x30] sm:$0xff] %v632_v9   ;;  %v721_v10 = vpop.f32.mrb[6].mxu0  ;;  %v733_v11 = vpop.f32.mrb[6].mxu1 }
 0x158   : > { %v323_v12 = vpop.f32.mrb[7].mxu0  ;;  %v363_v13 = vpop.f32.mrb[7].mxu1 }
 0x159   : > { %v617_v14 = vpack.c.bf16 %v721_v10, %v323_v12  ;;  %v637_v15 = vpack.c.bf16 %v733_v11, %v363_v13 }
 0x15b   : > { %641 = vst [vmem:[%s176_s17 + $0x18] sm:$0xff] %v617_v14   ;;  %645 = vst [vmem:[%s176_s17 + $0x38] sm:$0xff] %v637_v15  }
 0x15c   : > { %914 = shalt.err (!%p911_p7)
}
 0x15d   : > { %s915_s18 = scalar_lea.hbm %s1177_s23, 1024  ;;  %s919_s26 = scalar_lea.hbm %s1223_s2, 2048 }
 0x15e   : > { %p916_p9 = scmp.ne.s32.totalorder %s1177_s23, %s915_s18  ;;  %p920_p5 = scmp.lt.u32.totalorder %s1177_s23, %s1223_s2 }
 0x15f   : > { %p921_p11 = scmp.lt.u32.totalorder %s919_s26, %s915_s18  ;;  %p923_p4 = scmp.lt.u32.totalorder %s915_s18, %s1177_s23 }
 0x160   : > { %p917_p1 = pnand %p916_p9, %p1089_p12 }
 0x161   : > { %p922_p2 = por %p921_p11, %p920_p5 }
 0x162   : > { %p918_p0 = pneg %p917_p1 }
 0x163   : > { %p924_p6 = por %p923_p4, %p922_p2 }
 0x165   : > { %p925_p8 = pnand %p924_p6, %p918_p0 }
 0x167   : > { %928 = shalt.err (!%p925_p8)
}
 0x168   : > { %s978_s3 = smov 64   ;;  %s979_s15 = smov 4  }
 0x169   : > { %788 = dma.vmem_to_hbm [thread:$0]  (%p1089_p12), %s1172_s4, 1024, %s1177_s23, %s453_s13, %s978_s3, %s978_s3, %s979_s15  }
 0x16a PF: > { %s481_s17 = sand.u32 1, %s959_s9   ;;  %p1238_p10 = scmp.ne.s32.totalorder %s1228_s16, 0 }
 0x16b   : > { %p1239_p13 = scmp.ge.s32.totalorder %s971_s12, 2  ;;  %s482_s5 = scalar_lea.sflag [#allocation4], %s481_s17 }
 0x16d   : > { %p799_p3 = pnand %p1239_p13, %p1238_p10 }
 0x16f   : > { %954 = dma.done.wait (!%p799_p3), %s482_s5, 1024  }
 0x170   : > { %956 = vsyncadd (!%p799_p3), %s482_s5, 4294966272  ;;  %p16_p7 = scmp.ge.s32.totalorder %s1051_s21, 4   ;;  %s1240_s9 = smov %s963_s10 }
 0x171   : > { %s1241_s10 = smov %s967_s11  ;;  %s1242_s11 = smov %s1085_s8 }
 0x172   : > { %s1243_s12 = smov %s1051_s21  ;;  %18 = sbr.rel (!%p16_p7) target bundleno = 6 (0x6), region = 77 }
 0x179   :  { %487 = vsyncpa [#allocation3], 1 }
 0x17a   :  { %489 = vsyncpa [#allocation3 + $0x1], 1 }
 0x17b   :  { %490 = vsyncpa [#allocation6], 1 }
 0x17c   :  { %491 = vsyncpa [#allocation4], 1 }
 0x17d   :  { %493 = vsyncpa [#allocation4 + $0x1], 1 }

</bundles_post_ra>
